<compile_context>
chip_gen: v6e
topology: v6e:2x2x1
jax: 0.10.0
libtpu: 0.0.40
codegen_flags: <defaults>
</compile_context>

<pallas_src>
import functools
import math

import jax
import jax.numpy as jnp
from jax.experimental import pallas as pl
from jax.experimental.pallas import tpu as pltpu

_LANE = 128


def _round_up(x, m):
    return ((x + m - 1) // m) * m


def _pad2(a, rows, cols):
    pr, pc = rows - a.shape[0], cols - a.shape[1]
    if pr or pc:
        a = jnp.pad(a, ((0, pr), (0, pc)))
    return a


def _support_kernel(x_ref, w_ref, o_ref):
    """support[i] = X[i] @ W  (computed once; consumed by the aggregation kernel)."""
    o_ref[...] = jnp.dot(x_ref[...], w_ref[...],
                         preferred_element_type=jnp.float32).astype(o_ref.dtype)


def _agg_kernel(*refs, post_mm, activation, valid_cols):
    """One (TM, TK) step of out = act(adj @ rhs [@ W] + b)."""
    if post_mm:
        adj_ref, rhs_ref, w_ref, b_ref, o_ref, acc_ref = refs
    else:
        adj_ref, rhs_ref, b_ref, o_ref, acc_ref = refs
        w_ref = None

    k = pl.program_id(1)

    @pl.when(k == 0)
    def _init():
        acc_ref[...] = jnp.zeros_like(acc_ref)

    acc_ref[...] += jnp.dot(adj_ref[...], rhs_ref[...],
                            preferred_element_type=jnp.float32)

    @pl.when(k == pl.num_programs(1) - 1)
    def _finalize():
        acc = acc_ref[...]
        if post_mm:
            # (A @ X) @ W : one weight multiply per output row tile.
            acc = jnp.dot(acc.astype(w_ref.dtype), w_ref[...],
                          preferred_element_type=jnp.float32)
        out = acc + b_ref[...]                      # f32 epilogue (v5e-safe)
        if activation == "relu":
            out = jnp.maximum(out, 0.0)
        elif activation == "log_softmax":
            # Mask padded lanes so the softmax only spans real classes.
            col = jax.lax.broadcasted_iota(jnp.int32, out.shape, 1)
            valid = col < valid_cols
            logits = jnp.where(valid, out, jnp.float32(-1e30))
            m = jnp.max(logits, axis=-1, keepdims=True)
            e = jnp.where(valid, jnp.exp(logits - m), 0.0)
            lse = jnp.log(jnp.sum(e, axis=-1, keepdims=True)) + m
            out = jnp.where(valid, logits - lse, 0.0)
        o_ref[...] = out.astype(o_ref.dtype)


def gcn_layer(x, adj, weight, bias=None, *, activation=None,
              tm=256, tk=256, compute_dtype=jnp.bfloat16):
    """Pallas GraphConvolution: activation(adj @ (x @ weight) + bias)."""
    n, in_f = x.shape
    assert weight.shape[0] == in_f
    out_f = weight.shape[1]
    assert adj.shape == (n, n)

    out_p = _round_up(out_f, _LANE)                 # lane-dense output
    n_128 = _round_up(n, _LANE)
    tm = min(tm, n_128)
    tk = min(tk, n_128)
    n_pad = _round_up(n, math.lcm(tm, tk))

    x_p = _pad2(x, n_pad, in_f).astype(compute_dtype)
    adj_p = _pad2(adj, n_pad, n_pad).astype(compute_dtype)
    w_p = _pad2(weight, in_f, out_p).astype(compute_dtype)
    if bias is None:
        b_p = jnp.zeros((1, out_p), jnp.float32)
    else:
        b_p = _pad2(bias.reshape(1, out_f).astype(jnp.float32), 1, out_p)

    row_tiles = n_pad // tm
    k_tiles = n_pad // tk
    itm = jnp.dtype(compute_dtype).itemsize

    # adj@(X@W) when the output is narrow, (adj@X)@W when it is wide.
    xw_first = out_p <= in_f

    if xw_first:
        # --- support = X @ W, computed exactly once ----------------------
        support = pl.pallas_call(
            _support_kernel,
            out_shape=jax.ShapeDtypeStruct((n_pad, out_p), compute_dtype),
            grid=(row_tiles,),
            in_specs=[
                pl.BlockSpec((tm, in_f), lambda i: (i, 0)),
                pl.BlockSpec((in_f, out_p), lambda i: (0, 0)),   # resident
            ],
            out_specs=pl.BlockSpec((tm, out_p), lambda i: (i, 0)),
            compiler_params=pltpu.CompilerParams(
                dimension_semantics=("parallel",),
                vmem_limit_bytes=32 * 1024 * 1024,
            ),
            cost_estimate=pl.CostEstimate(
                flops=2 * n_pad * in_f * out_p,
                transcendentals=0,
                bytes_accessed=(n_pad * in_f + in_f * out_p
                                + n_pad * out_p) * itm),
        )(x_p, w_p)
        rhs = support
        rhs_cols = out_p
        agg_flops = 2 * n_pad * n_pad * out_p
    else:
        rhs = x_p
        rhs_cols = in_f
        agg_flops = 2 * n_pad * n_pad * in_f + 2 * n_pad * in_f * out_p

    post_mm = not xw_first
    transc = n_pad * out_p if activation == "log_softmax" else 0
    bytes_acc = (n_pad * n_pad * itm                       # adjacency
                 + n_pad * rhs_cols * itm * row_tiles      # rhs re-streamed per row tile
                 + (in_f * out_p * itm if post_mm else 0)  # resident weight
                 + out_p * 4                               # bias
                 + n_pad * out_p * 4)                      # output

    kernel = functools.partial(_agg_kernel, post_mm=post_mm,
                               activation=activation, valid_cols=out_f)

    in_specs = [
        pl.BlockSpec((tm, tk), lambda i, k: (i, k)),           # adj tile
        pl.BlockSpec((tk, rhs_cols), lambda i, k: (k, 0)),     # rhs k-tile
    ]
    operands = [adj_p, rhs]
    if post_mm:
        in_specs.append(pl.BlockSpec((in_f, out_p), lambda i, k: (0, 0)))  # W resident
        operands.append(w_p)
    in_specs.append(pl.BlockSpec((1, out_p), lambda i, k: (0, 0)))         # bias resident
    operands.append(b_p)

    out = pl.pallas_call(
        kernel,
        out_shape=jax.ShapeDtypeStruct((n_pad, out_p), jnp.float32),
        grid=(row_tiles, k_tiles),
        in_specs=in_specs,
        out_specs=pl.BlockSpec((tm, out_p), lambda i, k: (i, 0)),
        scratch_shapes=[pltpu.VMEM((tm, rhs_cols), jnp.float32)],
        compiler_params=pltpu.CompilerParams(
            dimension_semantics=("parallel", "arbitrary"),
            vmem_limit_bytes=32 * 1024 * 1024,     # safe on v5e/v6e/v7x
        ),
        cost_estimate=pl.CostEstimate(
            flops=agg_flops, transcendentals=transc, bytes_accessed=bytes_acc),
    )(*operands)

    return out[:n, :out_f]


def gcn_forward(x, adj, params, *, dropout=0.0, training=False, key=None):
    """Full GCN forward: log_softmax(gc2(dropout(relu(gc1(x, adj))), adj))."""
    w1, b1, w2, b2 = params
    h = gcn_layer(x, adj, w1, b1, activation="relu")
    if training and dropout > 0.0:
        # TODO(synk): fuse training-mode dropout into the second layer's kernel
        # with pltpu.prng_random_bits; at inference dropout is the identity.
        keep = jax.random.bernoulli(key, 1.0 - dropout, h.shape)
        h = jnp.where(keep, h / (1.0 - dropout), 0.0)
    return gcn_layer(h, adj, w2, b2, activation="log_softmax")


def init_gc_params(key, in_features, out_features, bias=True):
    """Matches GraphConvolution.reset_parameter: U(-stdv, stdv), stdv=1/sqrt(out)."""
    stdv = 1.0 / math.sqrt(out_features)
    k_w, k_b = jax.random.split(key)
    weight = jax.random.uniform(k_w, (in_features, out_features),
                                dtype=jnp.float32, minval=-stdv, maxval=stdv)
    b = None
    if bias:
        b = jax.random.uniform(k_b, (out_features,), dtype=jnp.float32,
                               minval=-stdv, maxval=stdv)
    return weight, b


if __name__ == "__main__":
    key = jax.random.PRNGKey(0)
    k_x, k_adj, k_p1, k_p2 = jax.random.split(key, 4)

    N = 256        # graph nodes
    NFEAT = 64     # input features
    NHID = 128     # hidden features (lane-dense)
    NCLASS = 16    # classes
    DROPOUT = 0.5  # unused at inference

    x = jax.random.normal(k_x, (N, NFEAT), dtype=jnp.float32)

    # Synthetic adjacency: sparse-ish 0/1 + self loops, row-normalized, dense.
    adj_raw = (jax.random.uniform(k_adj, (N, N)) < 0.1).astype(jnp.float32)
    adj_raw = adj_raw + jnp.eye(N, dtype=jnp.float32)
    adj = adj_raw / jnp.sum(adj_raw, axis=1, keepdims=True)

    w1, b1 = init_gc_params(k_p1, NFEAT, NHID, bias=True)
    w2, b2 = init_gc_params(k_p2, NHID, NCLASS, bias=True)

    out = gcn_forward(x, adj, (w1, b1, w2, b2),
                      dropout=DROPOUT, training=False)
    out = jax.block_until_ready(out)

    # Plain-JAX f32 reference (kernel uses bf16 matmul inputs -> loose tol).
    h_ref = jnp.maximum(adj @ (x @ w1) + b1[None, :], 0.0)
    logits_ref = adj @ (h_ref @ w2) + b2[None, :]
    ref = jax.nn.log_softmax(logits_ref, axis=1)

    assert out.shape == (N, NCLASS)
    assert jnp.all(jnp.isfinite(out)), "non-finite output"
    assert jnp.allclose(out, ref, atol=2e-2, rtol=2e-2), "mismatch vs reference"

    print("KERNEL_OK")
</pallas_src>

<mosaic_0001>
module attributes {stable_mosaic.version = 11 : i64} {
  func.func @_agg_kernel(%arg0: i32, %arg1: i32, %arg2: memref<256x256xbf16, #tpu.memory_space<vmem>>, %arg3: memref<256x64xbf16, #tpu.memory_space<vmem>>, %arg4: memref<64x128xbf16, #tpu.memory_space<vmem>>, %arg5: memref<1x128xf32, #tpu.memory_space<vmem>>, %arg6: memref<256x128xf32, #tpu.memory_space<vmem>>, %arg7: memref<256x64xf32, #tpu.memory_space<vmem>>) attributes {dimension_semantics = [#tpu.dimension_semantics<parallel>, #tpu.dimension_semantics<arbitrary>], iteration_bounds = array<i64: 1, 1>, scalar_prefetch = 0 : i64, scratch_operands = 1 : i64, tpu.core_type = #tpu.core_type<tc>, window_params = [{transform_indices = @transform_0, window_bounds = array<i64: 256, 256>}, {transform_indices = @transform_1, window_bounds = array<i64: 256, 64>}, {pipeline_mode = #tpu.pipeline_mode<synchronous>, transform_indices = @transform_2, window_bounds = array<i64: 64, 128>}, {pipeline_mode = #tpu.pipeline_mode<synchronous>, transform_indices = @transform_3, window_bounds = array<i64: 1, 128>}, {transform_indices = @transform_4, window_bounds = array<i64: 256, 128>}]} {
    %c0_i32 = arith.constant 0 : i32
    %0 = arith.cmpi eq, %arg1, %c0_i32 : i32
    %1 = arith.extui %0 : i1 to i32
    %c0_i32_0 = arith.constant 0 : i32
    %2 = arith.cmpi ne, %1, %c0_i32_0 : i32
    scf.if %2 {
      %cst_10 = arith.constant 0.000000e+00 : f32
      %12 = vector.broadcast %cst_10 : f32 to vector<256x64xf32>
      %c0_11 = arith.constant 0 : index
      %c0_12 = arith.constant 0 : index
      %13 = vector.load %arg7[%c0_11, %c0_12] : memref<256x64xf32, #tpu.memory_space<vmem>>, vector<256x64xf32>
      tpu.vector_store %arg7[%c0_11, %c0_12], %12 {strides = array<i32>} : memref<256x64xf32, #tpu.memory_space<vmem>>, vector<256x64xf32>,
    } else {
    }
    %c0 = arith.constant 0 : index
    %c0_1 = arith.constant 0 : index
    %3 = vector.load %arg7[%c0, %c0_1] : memref<256x64xf32, #tpu.memory_space<vmem>>, vector<256x64xf32>
    %c0_2 = arith.constant 0 : index
    %c0_3 = arith.constant 0 : index
    %4 = vector.load %arg2[%c0_2, %c0_3] : memref<256x256xbf16, #tpu.memory_space<vmem>>, vector<256x256xbf16>
    %c0_4 = arith.constant 0 : index
    %c0_5 = arith.constant 0 : index
    %5 = vector.load %arg3[%c0_4, %c0_5] : memref<256x64xbf16, #tpu.memory_space<vmem>>, vector<256x64xbf16>
    %cst = arith.constant dense<0.000000e+00> : vector<256x64xf32>
    %6 = tpu.matmul %4, %5, %cst {dimension_numbers = #tpu.dot_dimension_numbers<[1], [0], [0], [1], [0, 0, 1, 1], [], []>} : vector<256x256xbf16>, vector<256x64xbf16>, vector<256x64xf32> -> vector<256x64xf32>
    %7 = arith.addf %3, %6 : vector<256x64xf32>
    %c0_6 = arith.constant 0 : index
    %c0_7 = arith.constant 0 : index
    %8 = vector.load %arg7[%c0_6, %c0_7] : memref<256x64xf32, #tpu.memory_space<vmem>>, vector<256x64xf32>
    tpu.vector_store %arg7[%c0_6, %c0_7], %7 {strides = array<i32>} : memref<256x64xf32, #tpu.memory_space<vmem>>, vector<256x64xf32>,
    %c0_i32_8 = arith.constant 0 : i32
    %9 = arith.cmpi eq, %arg1, %c0_i32_8 : i32
    %10 = arith.extui %9 : i1 to i32
    %c0_i32_9 = arith.constant 0 : i32
    %11 = arith.cmpi ne, %10, %c0_i32_9 : i32
    scf.if %11 {
      %c0_10 = arith.constant 0 : index
      %c0_11 = arith.constant 0 : index
      %12 = vector.load %arg7[%c0_10, %c0_11] : memref<256x64xf32, #tpu.memory_space<vmem>>, vector<256x64xf32>
      %13 = arith.truncf %12 : vector<256x64xf32> to vector<256x64xbf16>
      %c0_12 = arith.constant 0 : index
      %c0_13 = arith.constant 0 : index
      %14 = vector.load %arg4[%c0_12, %c0_13] : memref<64x128xbf16, #tpu.memory_space<vmem>>, vector<64x128xbf16>
      %cst_14 = arith.constant dense<0.000000e+00> : vector<256x128xf32>
      %15 = tpu.matmul %13, %14, %cst_14 {dimension_numbers = #tpu.dot_dimension_numbers<[1], [0], [0], [1], [0, 0, 1, 1], [], []>} : vector<256x64xbf16>, vector<64x128xbf16>, vector<256x128xf32> -> vector<256x128xf32>
      %c0_15 = arith.constant 0 : index
      %c0_16 = arith.constant 0 : index
      %16 = vector.load %arg5[%c0_15, %c0_16] : memref<1x128xf32, #tpu.memory_space<vmem>>, vector<1x128xf32>
      %17 = vector.broadcast %16 : vector<1x128xf32> to vector<256x128xf32>
      %18 = arith.addf %15, %17 : vector<256x128xf32>
      %cst_17 = arith.constant 0.000000e+00 : f32
      %19 = vector.broadcast %cst_17 : f32 to vector<256x128xf32>
      %20 = arith.maximumf %18, %19 : vector<256x128xf32>
      %c0_18 = arith.constant 0 : index
      %c0_19 = arith.constant 0 : index
      %21 = vector.load %arg6[%c0_18, %c0_19] : memref<256x128xf32, #tpu.memory_space<vmem>>, vector<256x128xf32>
      tpu.vector_store %arg6[%c0_18, %c0_19], %20 {strides = array<i32>} : memref<256x128xf32, #tpu.memory_space<vmem>>, vector<256x128xf32>,
    } else {
    }
    return
  }
  func.func @transform_0(%arg0: i32, %arg1: i32) -> (i32, i32) {
    %c0_i32 = arith.constant 0 : i32
    return %arg0, %arg1 : i32, i32
  }
  func.func @transform_1(%arg0: i32, %arg1: i32) -> (i32, i32) {
    %c0_i32 = arith.constant 0 : i32
    %c0_i32_0 = arith.constant 0 : i32
    return %arg1, %c0_i32 : i32, i32
  }
  func.func @transform_2(%arg0: i32, %arg1: i32) -> (i32, i32) {
    %c0_i32 = arith.constant 0 : i32
    %c0_i32_0 = arith.constant 0 : i32
    %c0_i32_1 = arith.constant 0 : i32
    return %c0_i32, %c0_i32_0 : i32, i32
  }
  func.func @transform_3(%arg0: i32, %arg1: i32) -> (i32, i32) {
    %c0_i32 = arith.constant 0 : i32
    %c0_i32_0 = arith.constant 0 : i32
    %c0_i32_1 = arith.constant 0 : i32
    return %c0_i32, %c0_i32_0 : i32, i32
  }
  func.func @transform_4(%arg0: i32, %arg1: i32) -> (i32, i32) {
    %c0_i32 = arith.constant 0 : i32
    %c0_i32_0 = arith.constant 0 : i32
    return %arg0, %c0_i32 : i32, i32
  }
}

</mosaic_0001>

<bundles_post_ra>
// kernel: tpu_custom_call.1
= control target key start
LH: loop header
LB: loop body
LE: loop exit
PB: predicated region body
PF: predicated region fallthrough
CT: control target
= control target key end

     0   :  { %9 = vsyncpa [#allocation4], 0  ;;  %s1621_s0 = inlined_call_operand.hbm [shape: bf16[256,256], index: 0, kind: input, shape index: {}]   ;;  %s1622_s1 = inlined_call_operand.vmem [shape: bf16[256,64], index: 1, kind: input, shape index: {}]   ;;  %s1623_s2 = inlined_call_operand.vmem [shape: bf16[64,128], index: 2, kind: input, shape index: {}]   ;;  %s1624_s3 = inlined_call_operand.vmem [shape: f32[1,128], index: 3, kind: input, shape index: {}]   ;;  %s1625_s4 = inlined_call_operand.hbm [shape: f32[256,128], index: 4, kind: output, shape index: {}]  }
   0x1   :  { %10 = vsyncpa [#allocation5], 0  ;;  %s1402_s15 = smov [#allocation3]  }
   0x2   :  { %s16_s16 = sshll.u32 %s1402_s15, 4  ;;  %s17_s16 = int_to_ptr.vmem [resolvable:$true] %s16_s16 }
   0x3   :  { %s1366_s17 = scalar_lea.vmem %s17_s16, 4096  ;;  %p1371_p1 = scmp.lt.s32.totalorder %s17_s16, %s17_s16 }
   0x4   :  { %p1367_p0 = scmp.ne.s32.totalorder %s17_s16, %s1366_s17  ;;  %p1372_p2 = scmp.lt.s32.totalorder %s1366_s17, %s1366_s17 }
   0x6   :  { %p1373_p3 = por %p1372_p2, %p1371_p1 }
   0x8   :  { %p1374_p4 = pnand %p1373_p3, %p1367_p0 }
   0xa   :  { %1377 = shalt.err (!%p1374_p4)
}
   0xb   :  { %s1403_s18 = smov 128   ;;  %s1404_s19 = smov 8  }
   0xc   :  { %22 = dma.hbm_to_vmem [thread:$0]  %s1621_s0, 4096, %s17_s16, [#allocation4], %s1403_s18, %s1403_s18, %s1404_s19  }
   0xd   :  { %1398 = dma.done.wait [#allocation4], 4096  }
   0xe   :  { %1399 = vsyncadd [#allocation4], 4294963200  ;;  %v1290_v0 = vld [vmem:[%s1622_s1 + $0x78] sm:$0xff]   ;;  %v1292_v2 = vld [vmem:[%s1622_s1 + $0x70] sm:$0xff]   ;;  %vm37_vm0 = vcmask 523264   ;;  %v1405_v43 = vmov 0.0  }
   0xf   :  { %v1291_v1 = vld [vmem:[%s1622_s1 + $0x38] sm:$0xff]   ;;  %1097 = vmatprep.subr.bf16.mxu0 %v1290_v0  ;;  %1269 = vmatprep.subr.bf16.mxu1 %v1290_v0  ;;  %v1293_v3 = vld [vmem:[%s1622_s1 + $0x30] sm:$0xff]   ;;  %v1294_v4 = vld [vmem:[%s1622_s1 + $0x68] sm:$0xff]   ;;  %38 = vst.msk [vmem:[#allocation2] sm:$0xff] %vm37_vm0, %v1405_v43 }
  0x10   :  { %1098 = vmatpush3.bf16.msra.mxu0 %v1291_v1  ;;  %1277 = vmatpush3.bf16.msra.mxu1 %v1291_v1  ;;  %v1295_v5 = vld [vmem:[%s1622_s1 + $0x28] sm:$0xff]   ;;  %v1296_v6 = vld [vmem:[%s1622_s1 + $0x60] sm:$0xff]   ;;  %v1298_v8 = vld [vmem:[%s1622_s1 + $0x58] sm:$0xff]   ;;  %39 = vst.msk [vmem:[#allocation2 + $0x8] sm:$0xff] %vm37_vm0, %v1405_v43 }
  0x11   :  { %1099 = vmatprep.subr.bf16.mxu0 %v1292_v2  ;;  %1270 = vmatprep.subr.bf16.mxu1 %v1292_v2  ;;  %v1297_v7 = vld [vmem:[%s1622_s1 + $0x20] sm:$0xff]   ;;  %v1299_v9 = vld [vmem:[%s1622_s1 + $0x18] sm:$0xff]   ;;  %v1300_v10 = vld [vmem:[%s1622_s1 + $0x50] sm:$0xff]   ;;  %40 = vst.msk [vmem:[#allocation2 + $0x10] sm:$0xff] %vm37_vm0, %v1405_v43 }
  0x12   :  { %v1308_v11 = vld [vmem:[#allocation3 + $0x4] ss:$8 sps:$4 sm:$0xff]   ;;  %v1301_v12 = vld [vmem:[%s1622_s1 + $0x10] sm:$0xff]   ;;  %v1306_v17 = vld [vmem:[#allocation3] ss:$8 sps:$4 sm:$0xff]   ;;  %41 = vst.msk [vmem:[#allocation2 + $0x18] sm:$0xff] %vm37_vm0, %v1405_v43 }
  0x13   :  { %454 = vmatprep.mubr.bf16.mxu0 %v1308_v11  ;;  %v1302_v13 = vld [vmem:[%s1622_s1 + $0x48] sm:$0xff]   ;;  %v1304_v15 = vld [vmem:[%s1622_s1 + $0x40] sm:$0xff]   ;;  %v1309_v19 = vld [vmem:[#allocation3 + $0x14] ss:$8 sps:$4 sm:$0xff]   ;;  %42 = vst.msk [vmem:[#allocation2 + $0x20] sm:$0xff] %vm37_vm0, %v1405_v43 }
  0x14   :  { %1100 = vmatpush3.bf16.msra.mxu0 %v1293_v3  ;;  %1278 = vmatpush3.bf16.msra.mxu1 %v1293_v3  ;;  %v1303_v14 = vld [vmem:[%s1622_s1 + $0x8] sm:$0xff]   ;;  %v1305_v16 = vld [vmem:[%s1622_s1] sm:$0xff]   ;;  %v1342_v21 = vld [vmem:[#allocation3 + $0xd4] ss:$8 sps:$4 sm:$0xff]   ;;  %43 = vst.msk [vmem:[#allocation2 + $0x28] sm:$0xff] %vm37_vm0, %v1405_v43 }
  0x15   :  { %1101 = vmatprep.subr.bf16.mxu0 %v1294_v4  ;;  %1271 = vmatprep.subr.bf16.mxu1 %v1294_v4  ;;  %v1338_v18 = vld [vmem:[#allocation3 + $0xc4] ss:$8 sps:$4 sm:$0xff]   ;;  %v1336_v20 = vld [vmem:[#allocation3 + $0xc0] ss:$8 sps:$4 sm:$0xff]   ;;  %v1311_v22 = vld [vmem:[#allocation3 + $0x10] ss:$8 sps:$4 sm:$0xff]  }
  0x16   :  { %550 = vmatprep.mubr.bf16.mxu1 %v1338_v18  ;;  %v1312_v23 = vld [vmem:[#allocation3 + $0x24] ss:$8 sps:$4 sm:$0xff]   ;;  %v1344_v24 = vld [vmem:[#allocation3 + $0xd0] ss:$8 sps:$4 sm:$0xff]   ;;  %v1314_v26 = vld [vmem:[#allocation3 + $0x20] ss:$8 sps:$4 sm:$0xff]  }
  0x17   :  { %v1348_v25 = vld [vmem:[#allocation3 + $0xe4] ss:$8 sps:$4 sm:$0xff]   ;;  %v1315_v27 = vld [vmem:[#allocation3 + $0x34] ss:$8 sps:$4 sm:$0xff]   ;;  %v1350_v28 = vld [vmem:[#allocation3 + $0xe0] ss:$8 sps:$4 sm:$0xff]  }
  0x18   :  { %1102 = vmatpush3.bf16.msra.mxu0 %v1295_v5  ;;  %1279 = vmatpush3.bf16.msra.mxu1 %v1295_v5  ;;  %v1351_v29 = vld [vmem:[#allocation3 + $0xf4] ss:$8 sps:$4 sm:$0xff]   ;;  %v1317_v30 = vld [vmem:[#allocation3 + $0x30] ss:$8 sps:$4 sm:$0xff]   ;;  %v1318_v31 = vld [vmem:[#allocation3 + $0x44] ss:$8 sps:$4 sm:$0xff]  }
  0x19   :  { %1103 = vmatprep.subr.bf16.mxu0 %v1296_v6  ;;  %1272 = vmatprep.subr.bf16.mxu1 %v1296_v6  ;;  %v1353_v32 = vld [vmem:[#allocation3 + $0xf0] ss:$8 sps:$4 sm:$0xff]   ;;  %v1320_v33 = vld [vmem:[#allocation3 + $0x40] ss:$8 sps:$4 sm:$0xff]   ;;  %v1321_v34 = vld [vmem:[#allocation3 + $0x54] ss:$8 sps:$4 sm:$0xff]  }
  0x1a   :  { %v1323_v35 = vld [vmem:[#allocation3 + $0x50] ss:$8 sps:$4 sm:$0xff]   ;;  %v1324_v36 = vld [vmem:[#allocation3 + $0x64] ss:$8 sps:$4 sm:$0xff]   ;;  %v1326_v37 = vld [vmem:[#allocation3 + $0x60] ss:$8 sps:$4 sm:$0xff]  }
  0x1b   :  { %v1327_v38 = vld [vmem:[#allocation3 + $0x74] ss:$8 sps:$4 sm:$0xff]   ;;  %v1329_v39 = vld [vmem:[#allocation3 + $0x70] ss:$8 sps:$4 sm:$0xff]   ;;  %v1330_v40 = vld [vmem:[#allocation3 + $0x84] ss:$8 sps:$4 sm:$0xff]  }
  0x1c   :  { %1104 = vmatpush3.bf16.msra.mxu0 %v1297_v7  ;;  %1280 = vmatpush3.bf16.msra.mxu1 %v1297_v7  ;;  %v1332_v41 = vld [vmem:[#allocation3 + $0x80] ss:$8 sps:$4 sm:$0xff]   ;;  %v1333_v42 = vld [vmem:[#allocation3 + $0x94] ss:$8 sps:$4 sm:$0xff]   ;;  %44 = vst.msk [vmem:[#allocation2 + $0x30] sm:$0xff] %vm37_vm0, %v1405_v43  ;;  %45 = vst.msk [vmem:[#allocation2 + $0x38] sm:$0xff] %vm37_vm0, %v1405_v43 }
  0x1d   :  { %1105 = vmatprep.subr.bf16.mxu0 %v1298_v8  ;;  %1273 = vmatprep.subr.bf16.mxu1 %v1298_v8  ;;  %46 = vst.msk [vmem:[#allocation2 + $0x40] sm:$0xff] %vm37_vm0, %v1405_v43  ;;  %47 = vst.msk [vmem:[#allocation2 + $0x48] sm:$0xff] %vm37_vm0, %v1405_v43  ;;  %v1335_v44 = vld [vmem:[#allocation3 + $0x90] ss:$8 sps:$4 sm:$0xff]   ;;  %v1339_v45 = vld [vmem:[#allocation3 + $0xa4] ss:$8 sps:$4 sm:$0xff]  }
  0x1e   :  { %48 = vst.msk [vmem:[#allocation2 + $0x50] sm:$0xff] %vm37_vm0, %v1405_v43  ;;  %49 = vst.msk [vmem:[#allocation2 + $0x58] sm:$0xff] %vm37_vm0, %v1405_v43  ;;  %v1354_v46 = vld [vmem:[%s1623_s2 + $0x18] sm:$0xff]   ;;  %v1341_v47 = vld [vmem:[#allocation3 + $0xa0] ss:$8 sps:$4 sm:$0xff]  }
  0x1f   :  { %50 = vst.msk [vmem:[#allocation2 + $0x60] sm:$0xff] %vm37_vm0, %v1405_v43  ;;  %51 = vst.msk [vmem:[#allocation2 + $0x68] sm:$0xff] %vm37_vm0, %v1405_v43  ;;  %v1345_v48 = vld [vmem:[#allocation3 + $0xb4] ss:$8 sps:$4 sm:$0xff]   ;;  %v1356_v50 = vld [vmem:[%s1623_s2 + $0x8] sm:$0xff]  }
  0x20   :  { %1106 = vmatpush3.bf16.msra.mxu0 %v1299_v9  ;;  %1281 = vmatpush3.bf16.msra.mxu1 %v1299_v9  ;;  %52 = vst.msk [vmem:[#allocation2 + $0x70] sm:$0xff] %vm37_vm0, %v1405_v43  ;;  %53 = vst.msk [vmem:[#allocation2 + $0x78] sm:$0xff] %vm37_vm0, %v1405_v43  ;;  %v1355_v49 = vld [vmem:[%s1623_s2 + $0x10] sm:$0xff]   ;;  %v1357_v52 = vld [vmem:[%s1623_s2] sm:$0xff]  }
  0x21   :  { %1107 = vmatprep.subr.bf16.mxu0 %v1300_v10  ;;  %1274 = vmatprep.subr.bf16.mxu1 %v1300_v10  ;;  %54 = vst.msk [vmem:[#allocation2 + $0x80] sm:$0xff] %vm37_vm0, %v1405_v43  ;;  %55 = vst.msk [vmem:[#allocation2 + $0x88] sm:$0xff] %vm37_vm0, %v1405_v43  ;;  %v1347_v51 = vld [vmem:[#allocation3 + $0xb0] ss:$8 sps:$4 sm:$0xff]   ;;  %v70_v55 = vld [vmem:[#allocation2] sm:$0xff] }
  0x22   :  { %56 = vst.msk [vmem:[#allocation2 + $0x90] sm:$0xff] %vm37_vm0, %v1405_v43  ;;  %57 = vst.msk [vmem:[#allocation2 + $0x98] sm:$0xff] %vm37_vm0, %v1405_v43  ;;  %v71_v0 = vld [vmem:[#allocation2 + $0x8] sm:$0xff]  ;;  %v72_v10 = vld [vmem:[#allocation2 + $0x10] sm:$0xff] }
  0x23   :  { %58 = vst.msk [vmem:[#allocation2 + $0xa0] sm:$0xff] %vm37_vm0, %v1405_v43  ;;  %59 = vst.msk [vmem:[#allocation2 + $0xa8] sm:$0xff] %vm37_vm0, %v1405_v43 }
  0x24   :  { %1108 = vmatpush3.bf16.msra.mxu0 %v1301_v12  ;;  %1282 = vmatpush3.bf16.msra.mxu1 %v1301_v12  ;;  %60 = vst.msk [vmem:[#allocation2 + $0xb0] sm:$0xff] %vm37_vm0, %v1405_v43  ;;  %61 = vst.msk [vmem:[#allocation2 + $0xb8] sm:$0xff] %vm37_vm0, %v1405_v43 }
  0x25   :  { %1109 = vmatprep.subr.bf16.mxu0 %v1302_v13  ;;  %1275 = vmatprep.subr.bf16.mxu1 %v1302_v13  ;;  %62 = vst.msk [vmem:[#allocation2 + $0xc0] sm:$0xff] %vm37_vm0, %v1405_v43  ;;  %63 = vst.msk [vmem:[#allocation2 + $0xc8] sm:$0xff] %vm37_vm0, %v1405_v43 }
  0x26   :  { %64 = vst.msk [vmem:[#allocation2 + $0xd0] sm:$0xff] %vm37_vm0, %v1405_v43  ;;  %65 = vst.msk [vmem:[#allocation2 + $0xd8] sm:$0xff] %vm37_vm0, %v1405_v43 }
  0x27   :  { %66 = vst.msk [vmem:[#allocation2 + $0xe0] sm:$0xff] %vm37_vm0, %v1405_v43  ;;  %67 = vst.msk [vmem:[#allocation2 + $0xe8] sm:$0xff] %vm37_vm0, %v1405_v43 }
  0x28   :  { %1110 = vmatpush3.bf16.msra.mxu0 %v1303_v14  ;;  %1283 = vmatpush3.bf16.msra.mxu1 %v1303_v14  ;;  %68 = vst.msk [vmem:[#allocation2 + $0xf0] sm:$0xff] %vm37_vm0, %v1405_v43  ;;  %69 = vst.msk [vmem:[#allocation2 + $0xf8] sm:$0xff] %vm37_vm0, %v1405_v43  ;;  %v75_v43 = vld [vmem:[#allocation2 + $0x28] sm:$0xff] }
  0x29   :  { %1111 = vmatprep.subr.bf16.mxu0 %v1304_v15  ;;  %1276 = vmatprep.subr.bf16.mxu1 %v1304_v15 }
  0x2c   :  { %1112 = vmatpush3.bf16.msra.mxu0 %v1305_v16  ;;  %1284 = vmatpush3.bf16.msra.mxu1 %v1305_v16  ;;  %v94_v58 = vld [vmem:[#allocation2 + $0xc0] sm:$0xff]  ;;  %v95_v4 = vld [vmem:[#allocation2 + $0xc8] sm:$0xff] }
  0x2d   :  { %1229 = vmatprep.subr.bf16.mxu1 %v1354_v46  ;;  %v96_v14 = vld [vmem:[#allocation2 + $0xd0] sm:$0xff] }
  0x2f   :  { %455 = vmatmul.mubr.bf16.vlgmr.msra.gmra.mxu0 %v1306_v17  ;;  %551 = vmatmul.mubr.bf16.vlgmr.msra.gmra.mxu1 %v1336_v20  ;;  %v73_v20 = vld [vmem:[#allocation2 + $0x18] sm:$0xff] }
  0x30   :  { %462 = vmatprep.mubr.bf16.mxu0 %v1309_v19  ;;  %558 = vmatprep.mubr.bf16.mxu1 %v1342_v21 }
  0x31   :  { %1230 = vmatpush3.bf16.msra.mxu1 %v1354_v46 }
  0x32   :  { %1231 = vmatprep.subr.bf16.mxu1 %v1355_v49 }
  0x35   :  { %1232 = vmatpush3.bf16.msra.mxu1 %v1355_v49 }
  0x36   :  { %1233 = vmatprep.subr.bf16.mxu1 %v1356_v50 }
  0x37   :  { %463 = vmatmul.mubr.bf16.gmra.mxu0 %v1311_v22  ;;  %559 = vmatmul.mubr.bf16.gmra.mxu1 %v1344_v24  ;;  %v97_v24 = vld [vmem:[#allocation2 + $0xd8] sm:$0xff] }
  0x38   :  { %470 = vmatprep.mubr.bf16.mxu0 %v1312_v23  ;;  %566 = vmatprep.mubr.bf16.mxu1 %v1348_v25 }
  0x39   :  { %1234 = vmatpush3.bf16.msra.mxu1 %v1356_v50 }
  0x3a   :  { %1235 = vmatprep.subr.bf16.mxu1 %v1357_v52 }
  0x3d   :  { %1236 = vmatpush3.bf16.msra.mxu1 %v1357_v52 }
  0x3f   :  { %471 = vmatmul.mubr.bf16.gmra.mxu0 %v1314_v26  ;;  %567 = vmatmul.mubr.bf16.gmra.mxu1 %v1350_v28 }
  0x40   :  { %478 = vmatprep.mubr.bf16.mxu0 %v1315_v27  ;;  %574 = vmatprep.mubr.bf16.mxu1 %v1351_v29 }
  0x47   :  { %479 = vmatmul.mubr.bf16.gmra.mxu0 %v1317_v30  ;;  %575 = vmatmul.mubr.bf16.gmra.mxu1 %v1353_v32  ;;  %v74_v30 = vld [vmem:[#allocation2 + $0x20] sm:$0xff] }
  0x48   :  { %486 = vmatprep.mubr.bf16.mxu0 %v1318_v31 }
  0x4f   :  { %487 = vmatmul.mubr.bf16.gmra.mxu0 %v1320_v33 }
  0x50   :  { %494 = vmatprep.mubr.bf16.mxu0 %v1321_v34 }
  0x57   :  { %495 = vmatmul.mubr.bf16.gmra.mxu0 %v1323_v35 }
  0x58   :  { %502 = vmatprep.mubr.bf16.mxu0 %v1324_v36 }
  0x5f   :  { %503 = vmatmul.mubr.bf16.gmra.mxu0 %v1326_v37  ;;  %v98_v37 = vld [vmem:[#allocation2 + $0xe0] sm:$0xff] }
  0x60   :  { %510 = vmatprep.mubr.bf16.mxu0 %v1327_v38 }
  0x67   :  { %511 = vmatmul.mubr.bf16.gmra.mxu0 %v1329_v39 }
  0x68   :  { %518 = vmatprep.mubr.bf16.mxu0 %v1330_v40 }
  0x6f   :  { %519 = vmatmul.mubr.bf16.gmra.mxu0 %v1332_v41 }
  0x70   :  { %526 = vmatprep.mubr.bf16.mxu0 %v1333_v42 }
  0x77   :  { %527 = vmatmul.mubr.bf16.gmra.mxu0 %v1335_v44 }
  0x78   :  { %534 = vmatprep.mubr.bf16.mxu0 %v1339_v45 }
  0x7f   :  { %535 = vmatmul.mubr.bf16.gmra.mxu0 %v1341_v47  ;;  %v99_v47 = vld [vmem:[#allocation2 + $0xe8] sm:$0xff] }
  0x80   :  { %542 = vmatprep.mubr.bf16.mxu0 %v1345_v48 }
  0x87   :  { %543 = vmatmul.mubr.bf16.gmra.mxu0 %v1347_v51 }
  0xef   :  { %v1113_v53 = vpop.f32.mrf.mxu0  ;;  %v1185_v54 = vpop.f32.mrf.mxu1 }
  0xf1   :  { %v1114_v56 = vpop.f32.mrf.mxu0  ;;  %v1186_v59 = vpop.f32.mrf.mxu1 }
  0xf2   :  { %v1115_v57 = vadd.f32 %v1114_v56, %v1113_v53  ;;  %v1187_v61 = vadd.f32 %v1186_v59, %v1185_v54  ;;  %v76_v53 = vld [vmem:[#allocation2 + $0x30] sm:$0xff] }
  0xf3   :  { %v1116_v60 = vpop.f32.mrf.mxu0  ;;  %v1188_v63 = vpop.f32.mrf.mxu1 }
  0xf4   :  { %v583_v62 = vadd.f32 %v1115_v57, %v70_v55  ;;  %v607_v2 = vadd.f32 %v1187_v61, %v94_v58 }
  0xf5   :  { %v1117_v1 = vpop.f32.mrf.mxu0  ;;  %v1189_v5 = vpop.f32.mrf.mxu1 }
  0xf6   :  { %616 = vst.msk [vmem:[#allocation2] sm:$0xff] %vm37_vm0, %v583_v62  ;;  %v1118_v3 = vadd.f32 %v1117_v1, %v1116_v60  ;;  %640 = vst.msk [vmem:[#allocation2 + $0xc0] sm:$0xff] %vm37_vm0, %v607_v2  ;;  %v1190_v7 = vadd.f32 %v1189_v5, %v1188_v63  ;;  %v100_v60 = vld [vmem:[#allocation2 + $0xf0] sm:$0xff]  ;;  %v77_v2 = vld [vmem:[#allocation2 + $0x38] sm:$0xff] }
  0xf7   :  { %v1119_v6 = vpop.f32.mrf.mxu0  ;;  %v1191_v9 = vpop.f32.mrf.mxu1 }
  0xf8   :  { %v584_v8 = vadd.f32 %v1118_v3, %v71_v0  ;;  %v608_v12 = vadd.f32 %v1190_v7, %v95_v4 }
  0xf9   :  { %v1120_v11 = vpop.f32.mrf.mxu0  ;;  %v1192_v15 = vpop.f32.mrf.mxu1 }
  0xfa   :  { %617 = vst.msk [vmem:[#allocation2 + $0x8] sm:$0xff] %vm37_vm0, %v584_v8  ;;  %v1121_v13 = vadd.f32 %v1120_v11, %v1119_v6  ;;  %641 = vst.msk [vmem:[#allocation2 + $0xc8] sm:$0xff] %vm37_vm0, %v608_v12  ;;  %v1193_v17 = vadd.f32 %v1192_v15, %v1191_v9  ;;  %v101_v6 = vld [vmem:[#allocation2 + $0xf8] sm:$0xff]  ;;  %v78_v11 = vld [vmem:[#allocation2 + $0x40] sm:$0xff] }
  0xfb   :  { %v1122_v16 = vpop.f32.mrf.mxu0  ;;  %v1194_v19 = vpop.f32.mrf.mxu1 }
  0xfc   :  { %v585_v18 = vadd.f32 %v1121_v13, %v72_v10  ;;  %v609_v22 = vadd.f32 %v1193_v17, %v96_v14 }
  0xfd   :  { %v1123_v21 = vpop.f32.mrf.mxu0  ;;  %v1195_v25 = vpop.f32.mrf.mxu1  ;;  %v651_v32 = vld [vmem:[#allocation2] sm:$0xff] }
  0xfe   :  { %618 = vst.msk [vmem:[#allocation2 + $0x10] sm:$0xff] %vm37_vm0, %v585_v18  ;;  %v1124_v23 = vadd.f32 %v1123_v21, %v1122_v16  ;;  %642 = vst.msk [vmem:[#allocation2 + $0xd0] sm:$0xff] %vm37_vm0, %v609_v22  ;;  %v1196_v27 = vadd.f32 %v1195_v25, %v1194_v19  ;;  %v80_v25 = vld [vmem:[#allocation2 + $0x50] sm:$0xff] }
  0xff   :  { %v1125_v26 = vpop.f32.mrf.mxu0  ;;  %v1197_v29 = vpop.f32.mrf.mxu1 }
 0x100   :  { %v586_v28 = vadd.f32 %v1124_v23, %v73_v20  ;;  %v610_v34 = vadd.f32 %v1196_v27, %v97_v24  ;;  %v79_v20 = vld [vmem:[#allocation2 + $0x48] sm:$0xff] }
 0x101   :  { %v1126_v31 = vpop.f32.mrf.mxu0  ;;  %v652_v33 = vld [vmem:[#allocation2 + $0x8] sm:$0xff]  ;;  %v1198_v38 = vpop.f32.mrf.mxu1 }
 0x102   :  { %619 = vst.msk [vmem:[#allocation2 + $0x18] sm:$0xff] %vm37_vm0, %v586_v28  ;;  %v1127_v35 = vadd.f32 %v1126_v31, %v1125_v26  ;;  %v683_v36 = vpack.c.bf16 %v652_v33, %v651_v32  ;;  %643 = vst.msk [vmem:[#allocation2 + $0xd8] sm:$0xff] %vm37_vm0, %v610_v34  ;;  %v1199_v40 = vadd.f32 %v1198_v38, %v1197_v29  ;;  %v81_v33 = vld [vmem:[#allocation2 + $0x58] sm:$0xff]  ;;  %v82_v38 = vld [vmem:[#allocation2 + $0x60] sm:$0xff] }
 0x103   :  { %v1128_v39 = vpop.f32.mrf.mxu0  ;;  %v1200_v42 = vpop.f32.mrf.mxu1 }
 0x104   :  { %v587_v41 = vadd.f32 %v1127_v35, %v74_v30  ;;  %1237 = vmatprep.mubr.msk.bf16.mxu1 %vm37_vm0, %v683_v36  ;;  %v611_v45 = vadd.f32 %v1199_v40, %v98_v37 }
 0x105   :  { %v1129_v44 = vpop.f32.mrf.mxu0  ;;  %v1201_v48 = vpop.f32.mrf.mxu1  ;;  %v653_v55 = vld [vmem:[#allocation2 + $0x10] sm:$0xff] }
 0x106   :  { %620 = vst.msk [vmem:[#allocation2 + $0x20] sm:$0xff] %vm37_vm0, %v587_v41  ;;  %v1130_v46 = vadd.f32 %v1129_v44, %v1128_v39  ;;  %644 = vst.msk [vmem:[#allocation2 + $0xe0] sm:$0xff] %vm37_vm0, %v611_v45  ;;  %v1202_v50 = vadd.f32 %v1201_v48, %v1200_v42 }
 0x107   :  { %v1131_v49 = vpop.f32.mrf.mxu0  ;;  %v1203_v52 = vpop.f32.mrf.mxu1 }
 0x108   :  { %v588_v51 = vadd.f32 %v1130_v46, %v75_v43  ;;  %v612_v57 = vadd.f32 %v1202_v50, %v99_v47  ;;  %v83_v46 = vld [vmem:[#allocation2 + $0x68] sm:$0xff] }
 0x109   :  { %v1132_v54 = vpop.f32.mrf.mxu0  ;;  %v654_v56 = vld [vmem:[#allocation2 + $0x18] sm:$0xff]  ;;  %v1204_v61 = vpop.f32.mrf.mxu1 }
 0x10a   :  { %621 = vst.msk [vmem:[#allocation2 + $0x28] sm:$0xff] %vm37_vm0, %v588_v51  ;;  %v1133_v58 = vadd.f32 %v1132_v54, %v1131_v49  ;;  %v684_v59 = vpack.c.bf16 %v654_v56, %v653_v55  ;;  %645 = vst.msk [vmem:[#allocation2 + $0xe8] sm:$0xff] %vm37_vm0, %v612_v57  ;;  %v1205_v63 = vadd.f32 %v1204_v61, %v1203_v52  ;;  %v84_v51 = vld [vmem:[#allocation2 + $0x70] sm:$0xff] }
 0x10b   :  { %v1134_v62 = vpop.f32.mrf.mxu0  ;;  %v1206_v1 = vpop.f32.mrf.mxu1 }
 0x10c   :  { %v589_v0 = vadd.f32 %v1133_v58, %v76_v53  ;;  %1238 = vmatmul.mubr.msk.bf16.vlgmr.msra.gmra.mxu1 %vm37_vm0, %v684_v59  ;;  %v613_v4 = vadd.f32 %v1205_v63, %v100_v60  ;;  %v85_v59 = vld [vmem:[#allocation2 + $0x78] sm:$0xff] }
 0x10d   :  { %v1135_v3 = vpop.f32.mrf.mxu0  ;;  %v1207_v7 = vpop.f32.mrf.mxu1  ;;  %v655_v13 = vld [vmem:[#allocation2 + $0x20] sm:$0xff] }
 0x10e   :  { %622 = vst.msk [vmem:[#allocation2 + $0x30] sm:$0xff] %vm37_vm0, %v589_v0  ;;  %v1136_v5 = vadd.f32 %v1135_v3, %v1134_v62  ;;  %646 = vst.msk [vmem:[#allocation2 + $0xf0] sm:$0xff] %vm37_vm0, %v613_v4  ;;  %v1208_v9 = vadd.f32 %v1207_v7, %v1206_v1  ;;  %v86_v0 = vld [vmem:[#allocation2 + $0x80] sm:$0xff] }
 0x10f   :  { %v1137_v8 = vpop.f32.mrf.mxu0 }
 0x110   :  { %v590_v10 = vadd.f32 %v1136_v5, %v77_v2  ;;  %v614_v15 = vadd.f32 %v1208_v9, %v101_v6 }
 0x111   :  { %v1138_v12 = vpop.f32.mrf.mxu0  ;;  %v656_v14 = vld [vmem:[#allocation2 + $0x28] sm:$0xff] }
 0x112   :  { %623 = vst.msk [vmem:[#allocation2 + $0x38] sm:$0xff] %vm37_vm0, %v590_v10  ;;  %v1139_v16 = vadd.f32 %v1138_v12, %v1137_v8  ;;  %v685_v17 = vpack.c.bf16 %v656_v14, %v655_v13  ;;  %647 = vst.msk [vmem:[#allocation2 + $0xf8] sm:$0xff] %vm37_vm0, %v614_v15  ;;  %v87_v8 = vld [vmem:[#allocation2 + $0x88] sm:$0xff]  ;;  %v88_v13 = vld [vmem:[#allocation2 + $0x90] sm:$0xff] }
 0x113   :  { %v1140_v18 = vpop.f32.mrf.mxu0 }
 0x114   :  { %v591_v19 = vadd.f32 %v1139_v16, %v78_v11  ;;  %1241 = vmatprep.mubr.msk.bf16.mxu1 %vm37_vm0, %v685_v17 }
 0x115   :  { %v1141_v21 = vpop.f32.mrf.mxu0  ;;  %v657_v27 = vld [vmem:[#allocation2 + $0x30] sm:$0xff] }
 0x116   :  { %624 = vst.msk [vmem:[#allocation2 + $0x40] sm:$0xff] %vm37_vm0, %v591_v19  ;;  %v1142_v22 = vadd.f32 %v1141_v21, %v1140_v18  ;;  %v89_v21 = vld [vmem:[#allocation2 + $0x98] sm:$0xff] }
 0x117   :  { %v1143_v23 = vpop.f32.mrf.mxu0 }
 0x118   :  { %v592_v24 = vadd.f32 %v1142_v22, %v79_v20 }
 0x119   :  { %v1144_v26 = vpop.f32.mrf.mxu0  ;;  %v658_v28 = vld [vmem:[#allocation2 + $0x38] sm:$0xff] }
 0x11a   :  { %625 = vst.msk [vmem:[#allocation2 + $0x48] sm:$0xff] %vm37_vm0, %v592_v24  ;;  %v1145_v29 = vadd.f32 %v1144_v26, %v1143_v23  ;;  %v686_v30 = vpack.c.bf16 %v658_v28, %v657_v27  ;;  %v90_v26 = vld [vmem:[#allocation2 + $0xa0] sm:$0xff] }
 0x11b   :  { %v1146_v31 = vpop.f32.mrf.mxu0 }
 0x11c   :  { %v593_v32 = vadd.f32 %v1145_v29, %v80_v25  ;;  %1242 = vmatmul.mubr.msk.bf16.gmra.mxu1 %vm37_vm0, %v686_v30 }
 0x11d   :  { %v1147_v34 = vpop.f32.mrf.mxu0  ;;  %v659_v40 = vld [vmem:[#allocation2 + $0x40] sm:$0xff] }
 0x11e   :  { %626 = vst.msk [vmem:[#allocation2 + $0x50] sm:$0xff] %vm37_vm0, %v593_v32  ;;  %v1148_v35 = vadd.f32 %v1147_v34, %v1146_v31  ;;  %v91_v34 = vld [vmem:[#allocation2 + $0xa8] sm:$0xff] }
 0x11f   :  { %v1149_v36 = vpop.f32.mrf.mxu0 }
 0x120   :  { %v594_v37 = vadd.f32 %v1148_v35, %v81_v33 }
 0x121   :  { %v1150_v39 = vpop.f32.mrf.mxu0  ;;  %v660_v41 = vld [vmem:[#allocation2 + $0x48] sm:$0xff] }
 0x122   :  { %627 = vst.msk [vmem:[#allocation2 + $0x58] sm:$0xff] %vm37_vm0, %v594_v37  ;;  %v1151_v42 = vadd.f32 %v1150_v39, %v1149_v36  ;;  %v687_v43 = vpack.c.bf16 %v660_v41, %v659_v40  ;;  %v92_v39 = vld [vmem:[#allocation2 + $0xb0] sm:$0xff] }
 0x123   :  { %v1152_v44 = vpop.f32.mrf.mxu0 }
 0x124   :  { %v595_v45 = vadd.f32 %v1151_v42, %v82_v38  ;;  %1245 = vmatprep.mubr.msk.bf16.mxu1 %vm37_vm0, %v687_v43 }
 0x125   :  { %v1153_v47 = vpop.f32.mrf.mxu0  ;;  %v661_v53 = vld [vmem:[#allocation2 + $0x50] sm:$0xff] }
 0x126   :  { %628 = vst.msk [vmem:[#allocation2 + $0x60] sm:$0xff] %vm37_vm0, %v595_v45  ;;  %v1154_v48 = vadd.f32 %v1153_v47, %v1152_v44  ;;  %v93_v47 = vld [vmem:[#allocation2 + $0xb8] sm:$0xff] }
 0x127   :  { %v1155_v49 = vpop.f32.mrf.mxu0 }
 0x128   :  { %v596_v50 = vadd.f32 %v1154_v48, %v83_v46 }
 0x129   :  { %v1156_v52 = vpop.f32.mrf.mxu0  ;;  %v662_v54 = vld [vmem:[#allocation2 + $0x58] sm:$0xff] }
 0x12a   :  { %629 = vst.msk [vmem:[#allocation2 + $0x68] sm:$0xff] %vm37_vm0, %v596_v50  ;;  %v1157_v55 = vadd.f32 %v1156_v52, %v1155_v49  ;;  %v688_v56 = vpack.c.bf16 %v662_v54, %v661_v53  ;;  %v675_v54 = vld [vmem:[#allocation2 + $0xc0] sm:$0xff] }
 0x12b   :  { %v1158_v57 = vpop.f32.mrf.mxu0 }
 0x12c   :  { %v597_v58 = vadd.f32 %v1157_v55, %v84_v51  ;;  %1246 = vmatmul.mubr.msk.bf16.gmra.mxu1 %vm37_vm0, %v688_v56  ;;  %v676_v55 = vld [vmem:[#allocation2 + $0xc8] sm:$0xff] }
 0x12d   :  { %v1159_v60 = vpop.f32.mrf.mxu0  ;;  %v663_v2 = vld [vmem:[#allocation2 + $0x60] sm:$0xff] }
 0x12e   :  { %630 = vst.msk [vmem:[#allocation2 + $0x70] sm:$0xff] %vm37_vm0, %v597_v58  ;;  %v1160_v61 = vadd.f32 %v1159_v60, %v1158_v57  ;;  %v677_v60 = vld [vmem:[#allocation2 + $0xd0] sm:$0xff] }
 0x12f   :  { %v1161_v62 = vpop.f32.mrf.mxu0 }
 0x130   :  { %v598_v63 = vadd.f32 %v1160_v61, %v85_v59  ;;  %v695_v59 = vpack.c.bf16 %v676_v55, %v675_v54  ;;  %v678_v61 = vld [vmem:[#allocation2 + $0xd8] sm:$0xff] }
 0x131   :  { %v1162_v1 = vpop.f32.mrf.mxu0  ;;  %v664_v3 = vld [vmem:[#allocation2 + $0x68] sm:$0xff] }
 0x132   :  { %631 = vst.msk [vmem:[#allocation2 + $0x78] sm:$0xff] %vm37_vm0, %v598_v63  ;;  %v1163_v4 = vadd.f32 %v1162_v1, %v1161_v62  ;;  %v689_v5 = vpack.c.bf16 %v664_v3, %v663_v2  ;;  %v679_v62 = vld [vmem:[#allocation2 + $0xe0] sm:$0xff]  ;;  %v680_v63 = vld [vmem:[#allocation2 + $0xe8] sm:$0xff]  ;;  %v681_v2 = vld [vmem:[#allocation2 + $0xf0] sm:$0xff] }
 0x133   :  { %v1164_v6 = vpop.f32.mrf.mxu0  ;;  %v697_v1 = vpack.c.bf16 %v680_v63, %v679_v62  ;;  %v682_v3 = vld [vmem:[#allocation2 + $0xf8] sm:$0xff] }
 0x134   :  { %v599_v7 = vadd.f32 %v1163_v4, %v86_v0  ;;  %1249 = vmatprep.mubr.msk.bf16.mxu1 %vm37_vm0, %v689_v5  ;;  %v696_v0 = vpack.c.bf16 %v678_v61, %v677_v60  ;;  %v698_v4 = vpack.c.bf16 %v682_v3, %v681_v2  ;;  %v1581_v5 = vld [vmem:[%s1624_s3] ss:$0 sm:$0xff]  ;;  %s1406_s3 = smov [#allocation6]  }
 0x135   :  { %v1165_v9 = vpop.f32.mrf.mxu0  ;;  %v665_v15 = vld [vmem:[#allocation2 + $0x70] sm:$0xff]  ;;  %s1016_s10 = sshll.u32 %s1406_s3, 4  ;;  %s1017_s10 = int_to_ptr.vmem [resolvable:$true] %s1016_s10 }
 0x136   :  { %632 = vst.msk [vmem:[#allocation2 + $0x80] sm:$0xff] %vm37_vm0, %v599_v7  ;;  %v1166_v10 = vadd.f32 %v1165_v9, %v1164_v6  ;;  %s1378_s11 = scalar_lea.vmem %s1017_s10, 4096  ;;  %p1383_p6 = scmp.lt.s32.totalorder %s1017_s10, %s1017_s10 }
 0x137   :  { %v1167_v11 = vpop.f32.mrf.mxu0  ;;  %p1379_p5 = scmp.ne.s32.totalorder %s1017_s10, %s1378_s11  ;;  %p1384_p7 = scmp.lt.s32.totalorder %s1378_s11, %s1378_s11 }
 0x138   :  { %v600_v12 = vadd.f32 %v1166_v10, %v87_v8 }
 0x139   :  { %v1168_v14 = vpop.f32.mrf.mxu0  ;;  %v666_v16 = vld [vmem:[#allocation2 + $0x78] sm:$0xff]  ;;  %p1385_p8 = por %p1384_p7, %p1383_p6 }
 0x13a   :  { %633 = vst.msk [vmem:[#allocation2 + $0x88] sm:$0xff] %vm37_vm0, %v600_v12  ;;  %v1169_v17 = vadd.f32 %v1168_v14, %v1167_v11  ;;  %v690_v18 = vpack.c.bf16 %v666_v16, %v665_v15 }
 0x13b   :  { %v1170_v19 = vpop.f32.mrf.mxu0  ;;  %p1386_p9 = pnand %p1385_p8, %p1379_p5 }
 0x13c   :  { %v601_v20 = vadd.f32 %v1169_v17, %v88_v13  ;;  %1250 = vmatmul.mubr.msk.bf16.gmra.mxu1 %vm37_vm0, %v690_v18 }
 0x13d   :  { %v1171_v22 = vpop.f32.mrf.mxu0  ;;  %v667_v28 = vld [vmem:[#allocation2 + $0x80] sm:$0xff] }
 0x13e   :  { %634 = vst.msk [vmem:[#allocation2 + $0x90] sm:$0xff] %vm37_vm0, %v601_v20  ;;  %v1172_v23 = vadd.f32 %v1171_v22, %v1170_v19 }
 0x13f   :  { %v1173_v24 = vpop.f32.mrf.mxu0 }
 0x140   :  { %v602_v25 = vadd.f32 %v1172_v23, %v89_v21 }
 0x141   :  { %v1174_v27 = vpop.f32.mrf.mxu0  ;;  %v668_v29 = vld [vmem:[#allocation2 + $0x88] sm:$0xff] }
 0x142   :  { %635 = vst.msk [vmem:[#allocation2 + $0x98] sm:$0xff] %vm37_vm0, %v602_v25  ;;  %v1175_v30 = vadd.f32 %v1174_v27, %v1173_v24  ;;  %v691_v31 = vpack.c.bf16 %v668_v29, %v667_v28 }
 0x143   :  { %v1176_v32 = vpop.f32.mrf.mxu0 }
 0x144   :  { %v603_v33 = vadd.f32 %v1175_v30, %v90_v26  ;;  %1253 = vmatprep.mubr.msk.bf16.mxu1 %vm37_vm0, %v691_v31 }
 0x145   :  { %v1177_v35 = vpop.f32.mrf.mxu0  ;;  %v669_v41 = vld [vmem:[#allocation2 + $0x90] sm:$0xff] }
 0x146   :  { %636 = vst.msk [vmem:[#allocation2 + $0xa0] sm:$0xff] %vm37_vm0, %v603_v33  ;;  %v1178_v36 = vadd.f32 %v1177_v35, %v1176_v32 }
 0x147   :  { %v1179_v37 = vpop.f32.mrf.mxu0 }
 0x148   :  { %v604_v38 = vadd.f32 %v1178_v36, %v91_v34 }
 0x149   :  { %v1180_v40 = vpop.f32.mrf.mxu0  ;;  %v670_v42 = vld [vmem:[#allocation2 + $0x98] sm:$0xff] }
 0x14a   :  { %637 = vst.msk [vmem:[#allocation2 + $0xa8] sm:$0xff] %vm37_vm0, %v604_v38  ;;  %v1181_v43 = vadd.f32 %v1180_v40, %v1179_v37  ;;  %v692_v44 = vpack.c.bf16 %v670_v42, %v669_v41 }
 0x14b   :  { %v1182_v45 = vpop.f32.mrf.mxu0 }
 0x14c   :  { %v605_v46 = vadd.f32 %v1181_v43, %v92_v39  ;;  %1254 = vmatmul.mubr.msk.bf16.gmra.mxu1 %vm37_vm0, %v692_v44 }
 0x14d   :  { %v1183_v48 = vpop.f32.mrf.mxu0  ;;  %v671_v51 = vld [vmem:[#allocation2 + $0xa0] sm:$0xff] }
 0x14e   :  { %638 = vst.msk [vmem:[#allocation2 + $0xb0] sm:$0xff] %vm37_vm0, %v605_v46  ;;  %v1184_v49 = vadd.f32 %v1183_v48, %v1182_v45 }
 0x150   :  { %v606_v50 = vadd.f32 %v1184_v49, %v93_v47 }
 0x151   :  { %v672_v52 = vld [vmem:[#allocation2 + $0xa8] sm:$0xff] }
 0x152   :  { %639 = vst.msk [vmem:[#allocation2 + $0xb8] sm:$0xff] %vm37_vm0, %v606_v50  ;;  %v693_v53 = vpack.c.bf16 %v672_v52, %v671_v51 }
 0x154   :  { %1257 = vmatprep.mubr.msk.bf16.mxu1 %vm37_vm0, %v693_v53 }
 0x155   :  { %v673_v56 = vld [vmem:[#allocation2 + $0xb0] sm:$0xff] }
 0x159   :  { %v674_v57 = vld [vmem:[#allocation2 + $0xb8] sm:$0xff] }
 0x15a   :  { %v694_v58 = vpack.c.bf16 %v674_v57, %v673_v56 }
 0x15c   :  { %1258 = vmatmul.mubr.msk.bf16.gmra.mxu1 %vm37_vm0, %v694_v58 }
 0x15d   :  { %1261 = vmatprep.mubr.msk.bf16.mxu1 %vm37_vm0, %v695_v59 }
 0x164   :  { %1262 = vmatmul.mubr.msk.bf16.gmra.mxu1 %vm37_vm0, %v696_v0 }
 0x165   :  { %1265 = vmatprep.mubr.msk.bf16.mxu1 %vm37_vm0, %v697_v1 }
 0x16c   :  { %1266 = vmatmul.mubr.msk.bf16.gmra.mxu1 %vm37_vm0, %v698_v4 }
 0x1cc   :  { %v1239_v6 = vpop.f32.mrf.mxu1 }
 0x1cd   :  { %v829_v7 = vadd.f32 %v1239_v6, %v1581_v5 }
 0x1ce   :  { %v820_v8 = vpop.f32.mrf.mxu1 }
 0x1cf   :  { %v949_v9 = vmax.f32 %v829_v7, 0.0  ;;  %v821_v10 = vadd.f32 %v1581_v5, %v820_v8 }
 0x1d0   :  { %v1240_v11 = vpop.f32.mrf.mxu1 }
 0x1d1   :  { %981 = vst [vmem:[#allocation6 + $0x10] sm:$0xff] %v949_v9  ;;  %v947_v12 = vmax.f32 %v821_v10, 0.0  ;;  %v832_v13 = vadd.f32 %v1240_v11, %v1581_v5 }
 0x1d2   :  { %v823_v14 = vpop.f32.mrf.mxu1 }
 0x1d3   :  { %979 = vst [vmem:[#allocation6] sm:$0xff] %v947_v12  ;;  %v950_v15 = vmax.f32 %v832_v13, 0.0  ;;  %v824_v16 = vadd.f32 %v1581_v5, %v823_v14 }
 0x1d5   :  { %982 = vst [vmem:[#allocation6 + $0x18] sm:$0xff] %v950_v15  ;;  %v948_v17 = vmax.f32 %v824_v16, 0.0 }
 0x1d7   :  { %980 = vst [vmem:[#allocation6 + $0x8] sm:$0xff] %v948_v17 }
 0x1dc   :  { %v1243_v18 = vpop.f32.mrf.mxu1 }
 0x1dd   :  { %v845_v19 = vadd.f32 %v1243_v18, %v1581_v5 }
 0x1de   :  { %v836_v20 = vpop.f32.mrf.mxu1 }
 0x1df   :  { %v953_v21 = vmax.f32 %v845_v19, 0.0  ;;  %v837_v22 = vadd.f32 %v1581_v5, %v836_v20 }
 0x1e0   :  { %v1244_v23 = vpop.f32.mrf.mxu1 }
 0x1e1   :  { %985 = vst [vmem:[#allocation6 + $0x30] sm:$0xff] %v953_v21  ;;  %v951_v24 = vmax.f32 %v837_v22, 0.0  ;;  %v848_v25 = vadd.f32 %v1244_v23, %v1581_v5 }
 0x1e2   :  { %v839_v26 = vpop.f32.mrf.mxu1 }
 0x1e3   :  { %983 = vst [vmem:[#allocation6 + $0x20] sm:$0xff] %v951_v24  ;;  %v954_v27 = vmax.f32 %v848_v25, 0.0  ;;  %v840_v28 = vadd.f32 %v1581_v5, %v839_v26 }
 0x1e5   :  { %986 = vst [vmem:[#allocation6 + $0x38] sm:$0xff] %v954_v27  ;;  %v952_v29 = vmax.f32 %v840_v28, 0.0 }
 0x1e7   :  { %984 = vst [vmem:[#allocation6 + $0x28] sm:$0xff] %v952_v29 }
 0x1ec   :  { %v1247_v30 = vpop.f32.mrf.mxu1 }
 0x1ed   :  { %v861_v31 = vadd.f32 %v1247_v30, %v1581_v5 }
 0x1ee   :  { %v852_v32 = vpop.f32.mrf.mxu1 }
 0x1ef   :  { %v957_v33 = vmax.f32 %v861_v31, 0.0  ;;  %v853_v34 = vadd.f32 %v1581_v5, %v852_v32 }
 0x1f0   :  { %v1248_v35 = vpop.f32.mrf.mxu1 }
 0x1f1   :  { %989 = vst [vmem:[#allocation6 + $0x50] sm:$0xff] %v957_v33  ;;  %v955_v36 = vmax.f32 %v853_v34, 0.0  ;;  %v864_v37 = vadd.f32 %v1248_v35, %v1581_v5 }
 0x1f2   :  { %v855_v38 = vpop.f32.mrf.mxu1 }
 0x1f3   :  { %987 = vst [vmem:[#allocation6 + $0x40] sm:$0xff] %v955_v36  ;;  %v958_v39 = vmax.f32 %v864_v37, 0.0  ;;  %v856_v40 = vadd.f32 %v1581_v5, %v855_v38 }
 0x1f5   :  { %990 = vst [vmem:[#allocation6 + $0x58] sm:$0xff] %v958_v39  ;;  %v956_v41 = vmax.f32 %v856_v40, 0.0 }
 0x1f7   :  { %988 = vst [vmem:[#allocation6 + $0x48] sm:$0xff] %v956_v41 }
 0x1fc   :  { %v1251_v42 = vpop.f32.mrf.mxu1 }
 0x1fd   :  { %v877_v43 = vadd.f32 %v1251_v42, %v1581_v5 }
 0x1fe   :  { %v868_v44 = vpop.f32.mrf.mxu1 }
 0x1ff   :  { %v961_v45 = vmax.f32 %v877_v43, 0.0  ;;  %v869_v46 = vadd.f32 %v1581_v5, %v868_v44 }
 0x200   :  { %v1252_v47 = vpop.f32.mrf.mxu1 }
 0x201   :  { %993 = vst [vmem:[#allocation6 + $0x70] sm:$0xff] %v961_v45  ;;  %v959_v48 = vmax.f32 %v869_v46, 0.0  ;;  %v880_v49 = vadd.f32 %v1252_v47, %v1581_v5 }
 0x202   :  { %v871_v50 = vpop.f32.mrf.mxu1 }
 0x203   :  { %991 = vst [vmem:[#allocation6 + $0x60] sm:$0xff] %v959_v48  ;;  %v962_v51 = vmax.f32 %v880_v49, 0.0  ;;  %v872_v52 = vadd.f32 %v1581_v5, %v871_v50 }
 0x205   :  { %994 = vst [vmem:[#allocation6 + $0x78] sm:$0xff] %v962_v51  ;;  %v960_v53 = vmax.f32 %v872_v52, 0.0 }
 0x207   :  { %992 = vst [vmem:[#allocation6 + $0x68] sm:$0xff] %v960_v53 }
 0x20c   :  { %v1255_v54 = vpop.f32.mrf.mxu1 }
 0x20d   :  { %v893_v55 = vadd.f32 %v1255_v54, %v1581_v5 }
 0x20e   :  { %v884_v56 = vpop.f32.mrf.mxu1 }
 0x20f   :  { %v965_v57 = vmax.f32 %v893_v55, 0.0  ;;  %v885_v58 = vadd.f32 %v1581_v5, %v884_v56 }
 0x210   :  { %v1256_v59 = vpop.f32.mrf.mxu1 }
 0x211   :  { %997 = vst [vmem:[#allocation6 + $0x90] sm:$0xff] %v965_v57  ;;  %v963_v60 = vmax.f32 %v885_v58, 0.0  ;;  %v896_v61 = vadd.f32 %v1256_v59, %v1581_v5 }
 0x212   :  { %v887_v62 = vpop.f32.mrf.mxu1 }
 0x213   :  { %995 = vst [vmem:[#allocation6 + $0x80] sm:$0xff] %v963_v60  ;;  %v966_v63 = vmax.f32 %v896_v61, 0.0  ;;  %v888_v0 = vadd.f32 %v1581_v5, %v887_v62 }
 0x215   :  { %998 = vst [vmem:[#allocation6 + $0x98] sm:$0xff] %v966_v63  ;;  %v964_v1 = vmax.f32 %v888_v0, 0.0 }
 0x217   :  { %996 = vst [vmem:[#allocation6 + $0x88] sm:$0xff] %v964_v1 }
 0x21c   :  { %v1259_v2 = vpop.f32.mrf.mxu1 }
 0x21d   :  { %v909_v3 = vadd.f32 %v1259_v2, %v1581_v5 }
 0x21e   :  { %v900_v4 = vpop.f32.mrf.mxu1 }
 0x21f   :  { %v969_v6 = vmax.f32 %v909_v3, 0.0  ;;  %v901_v7 = vadd.f32 %v1581_v5, %v900_v4 }
 0x220   :  { %v1260_v8 = vpop.f32.mrf.mxu1 }
 0x221   :  { %1001 = vst [vmem:[#allocation6 + $0xb0] sm:$0xff] %v969_v6  ;;  %v967_v9 = vmax.f32 %v901_v7, 0.0  ;;  %v912_v10 = vadd.f32 %v1260_v8, %v1581_v5 }
 0x222   :  { %v903_v11 = vpop.f32.mrf.mxu1 }
 0x223   :  { %999 = vst [vmem:[#allocation6 + $0xa0] sm:$0xff] %v967_v9  ;;  %v970_v12 = vmax.f32 %v912_v10, 0.0  ;;  %v904_v13 = vadd.f32 %v1581_v5, %v903_v11 }
 0x224   :  { %v1263_v14 = vpop.f32.mrf.mxu1 }
 0x225   :  { %1002 = vst [vmem:[#allocation6 + $0xb8] sm:$0xff] %v970_v12  ;;  %v968_v15 = vmax.f32 %v904_v13, 0.0  ;;  %v925_v16 = vadd.f32 %v1263_v14, %v1581_v5 }
 0x226   :  { %v916_v17 = vpop.f32.mrf.mxu1 }
 0x227   :  { %1000 = vst [vmem:[#allocation6 + $0xa8] sm:$0xff] %v968_v15  ;;  %v973_v18 = vmax.f32 %v925_v16, 0.0  ;;  %v917_v19 = vadd.f32 %v1581_v5, %v916_v17 }
 0x228   :  { %v1264_v20 = vpop.f32.mrf.mxu1 }
 0x229   :  { %1005 = vst [vmem:[#allocation6 + $0xd0] sm:$0xff] %v973_v18  ;;  %v971_v21 = vmax.f32 %v917_v19, 0.0  ;;  %v928_v22 = vadd.f32 %v1264_v20, %v1581_v5 }
 0x22a   :  { %v919_v23 = vpop.f32.mrf.mxu1 }
 0x22b   :  { %1003 = vst [vmem:[#allocation6 + $0xc0] sm:$0xff] %v971_v21  ;;  %v974_v24 = vmax.f32 %v928_v22, 0.0  ;;  %v920_v25 = vadd.f32 %v1581_v5, %v919_v23 }
 0x22c   :  { %v1267_v26 = vpop.f32.mrf.mxu1 }
 0x22d   :  { %1006 = vst [vmem:[#allocation6 + $0xd8] sm:$0xff] %v974_v24  ;;  %v972_v27 = vmax.f32 %v920_v25, 0.0  ;;  %v941_v28 = vadd.f32 %v1267_v26, %v1581_v5 }
 0x22e   :  { %v932_v29 = vpop.f32.mrf.mxu1 }
 0x22f   :  { %1004 = vst [vmem:[#allocation6 + $0xc8] sm:$0xff] %v972_v27  ;;  %v977_v30 = vmax.f32 %v941_v28, 0.0  ;;  %v933_v31 = vadd.f32 %v1581_v5, %v932_v29 }
 0x230   :  { %v1268_v32 = vpop.f32.mrf.mxu1 }
 0x231   :  { %1009 = vst [vmem:[#allocation6 + $0xf0] sm:$0xff] %v977_v30  ;;  %v975_v33 = vmax.f32 %v933_v31, 0.0  ;;  %v944_v34 = vadd.f32 %v1268_v32, %v1581_v5 }
 0x232   :  { %v935_v35 = vpop.f32.mrf.mxu1 }
 0x233   :  { %1007 = vst [vmem:[#allocation6 + $0xe0] sm:$0xff] %v975_v33  ;;  %v978_v36 = vmax.f32 %v944_v34, 0.0  ;;  %v936_v37 = vadd.f32 %v1581_v5, %v935_v35 }
 0x235   :  { %1010 = vst [vmem:[#allocation6 + $0xf8] sm:$0xff] %v978_v36  ;;  %v976_v38 = vmax.f32 %v936_v37, 0.0 }
 0x237   :  { %1008 = vst [vmem:[#allocation6 + $0xe8] sm:$0xff] %v976_v38 }
 0x238   :  { %1389 = shalt.err (!%p1386_p9)
}
 0x239   :  { %1022 = dma.vmem_to_hbm [thread:$0]  %s1017_s10, 4096, %s1625_s4, [#allocation5], %s1403_s18, %s1403_s18, %s1404_s19  }
 0x23a   :  { %1400 = dma.done.wait [#allocation5], 4096  }
 0x23b   :  { %1401 = vsyncadd [#allocation5], 4294963200 }
 0x23c   :  { %1026 = vsyncpa [#allocation4], 1 }
 0x23d   :  { %1027 = vsyncpa [#allocation5], 1 }

</bundles_post_ra>
